<compile_context>
chip_gen: v7x
topology: tpu7x:2x2x1
jax: 0.10.0
libtpu: 0.0.40
codegen_flags: <defaults>
</compile_context>

<pallas_src>
import math
import numpy as np
import jax
import jax.numpy as jnp
from jax.experimental import pallas as pl
from jax.experimental.pallas import tpu as pltpu

LANE = 128      # TPU lane width: embedding dim and batch tiles pad to this
SUBLANE = 8


def _round_up(x, m):
    return (x + m - 1) // m * m


def _vmem_limit(tile_bytes):
    # double-buffered tiles + headroom, floor 16 MiB, capped at the v7x-safe
    # 64 MiB physical budget (v5e/v6e have 128 MiB, so this is conservative).
    return int(min(64 * 2**20, max(16 * 2**20, 8 * tile_bytes)))


# ----------------------------- Pallas kernels -----------------------------

def _score_kernel(lhs_ref, rhs_ref, trans_ref, out_ref):
    """Positive-score kernel, vectorized over a whole batch tile.

    lhs_ref / rhs_ref / trans_ref : (Dp, TB) f32 tiles (embedding dim on the
    sublane axis, batch on the lane axis).  out_ref : (1, TB) f32 lane-dense
    scores, so the writeback is an unmasked full-vreg store.
      score_b = sum_d lhs[d,b] * (rhs[d,b] + trans[d,b])
    """
    prod = lhs_ref[...] * (rhs_ref[...] + trans_ref[...])
    out_ref[...] = jnp.sum(prod, axis=0, keepdims=True)


def twhin_score(lhs_t, rhs_t, trans_t, *, batch_tile=LANE):
    dp, bp = lhs_t.shape
    assert dp % SUBLANE == 0 and batch_tile % LANE == 0 and bp % batch_tile == 0
    spec = pl.BlockSpec((dp, batch_tile), lambda i: (0, i))
    tile_bytes = (3 * dp * batch_tile + batch_tile) * 4
    return pl.pallas_call(
        _score_kernel,
        out_shape=jax.ShapeDtypeStruct((1, bp), jnp.float32),
        grid=(bp // batch_tile,),
        in_specs=[spec, spec, spec],
        out_specs=pl.BlockSpec((1, batch_tile), lambda i: (0, i)),
        compiler_params=pltpu.CompilerParams(
            dimension_semantics=("parallel",),     # batch tiles across TCs on v7x
            vmem_limit_bytes=_vmem_limit(tile_bytes)),
        cost_estimate=pl.CostEstimate(
            flops=3 * dp * bp, transcendentals=0,
            bytes_accessed=(3 * dp * bp + bp) * 4),
    )(lhs_t, rhs_t, trans_t)


def _neg_matmul_kernel(a_ref, bt_ref, o_ref):
    """One in-batch-negatives matmul group per grid step, on the MXU.

    a_ref : (M, Dp)   bt_ref : (Dp, N) -- RHS arrives pre-transposed so the
    contraction is (1,)x(0,) and no in-kernel XLU transpose is needed.
    o_ref : (M, N).
    """
    # TODO(synk): at production sizes cast a/bt to bf16 (keep f32 accumulation
    # via preferred_element_type) for 2x MXU throughput on v6e/v7x.
    o_ref[...] = jnp.dot(a_ref[...], bt_ref[...],
                         preferred_element_type=jnp.float32)


def neg_scores_batched(a, bt):
    """a: (G, M, Dp), bt: (G, Dp, N) -> (G, M, N). All groups in one call."""
    g, m, dp = a.shape
    _, _, n = bt.shape
    assert m % SUBLANE == 0 and dp % LANE == 0 and n % LANE == 0
    tile_bytes = (m * dp + dp * n + m * n) * 4
    return pl.pallas_call(
        _neg_matmul_kernel,
        out_shape=jax.ShapeDtypeStruct((g, m, n), jnp.float32),
        grid=(g,),
        in_specs=[pl.BlockSpec((None, m, dp), lambda i: (i, 0, 0)),
                  pl.BlockSpec((None, dp, n), lambda i: (i, 0, 0))],
        out_specs=pl.BlockSpec((None, m, n), lambda i: (i, 0, 0)),
        compiler_params=pltpu.CompilerParams(
            dimension_semantics=("parallel",),
            vmem_limit_bytes=_vmem_limit(tile_bytes)),
        cost_estimate=pl.CostEstimate(
            flops=2 * g * m * n * dp, transcendentals=0,
            bytes_accessed=g * tile_bytes),
    )(a, bt)


# ------------------------- IntegerLookup / KJT glue -------------------------

def build_integer_lookup(vocab):
    """IntegerLookup: vocab id -> position+1, unknown / >= max+1 -> 0."""
    max_id = max(vocab) + 1
    arr = np.zeros((max_id,), dtype=np.int32)
    arr[np.asarray(vocab)] = np.arange(1, len(vocab) + 1, dtype=np.int32)
    return arr, max_id


def remap_ids(ids, lookup_arr, max_id):
    ids = np.asarray(ids)
    safe = np.where(ids >= max_id, 0, ids)          # x[x >= self.max] = 0
    return lookup_arr[safe].astype(np.int32)


# ---------------------------------- main ----------------------------------

if __name__ == "__main__":
    key = jax.random.PRNGKey(0)

    # model config (small, consistent with TwHIN.__init__)
    node_config = {
        "user": [3, 7, 11, 19, 25],
        "item": [2, 5, 8, 13, 17, 21, 29],
    }
    table_names = list(node_config.keys())
    embedding_dim = 64
    relations_type = [[0, 1], [1, 0]]        # per relation: (lhs_table, rhs_table)
    num_relations = len(relations_type)
    in_batch_negatives = 4

    # deterministic parameter init (stand-in for torchrec EmbeddingBagCollection)
    keys = jax.random.split(key, len(table_names) + 1)
    table_weights = []
    for i, name in enumerate(table_names):
        n_rows = len(node_config[name]) + 1   # +1 OOV row (IntegerLookup unk -> 0)
        w = jax.random.uniform(keys[i], (n_rows, embedding_dim),
                               dtype=jnp.float32, minval=-0.1, maxval=0.1)
        table_weights.append(w)
    emb_table = jnp.concatenate(table_weights, axis=0)           # (V_total, D)
    table_offsets = np.cumsum([0] + [w.shape[0] for w in table_weights[:-1]])
    # all_trans_embs = uniform_(empty(R, D)) -> U[0, 1)
    all_trans_embs = jax.random.uniform(keys[-1], (num_relations, embedding_dim),
                                        dtype=jnp.float32)

    lookups = {i: build_integer_lookup(node_config[name])
               for i, name in enumerate(table_names)}

    # example inputs
    batch = 4
    lhs = np.array([7, 13, 3, 999], dtype=np.int64)   # 999 -> OOV row
    rhs = np.array([5, 19, 8, 25], dtype=np.int64)
    rel = np.array([0, 1, 0, 1], dtype=np.int32)

    relations_np = np.asarray(relations_type, dtype=np.int32)
    lhs_tables = relations_np[rel, 0]
    rhs_tables = relations_np[rel, 1]

    def rows_for(ids, tables):
        rows = np.zeros((batch,), dtype=np.int32)
        for t in range(len(table_names)):
            arr, max_id = lookups[t]
            remapped = remap_ids(ids, arr, max_id)
            rows = np.where(tables == t, table_offsets[t] + remapped, rows)
        return rows.astype(np.int32)

    lhs_rows = rows_for(lhs, lhs_tables)
    rhs_rows = rows_for(rhs, rhs_tables)

    # ----------------- device-side data prep (stays on device) -------------
    D = embedding_dim
    Dp = _round_up(D, LANE)                 # pad 64 -> 128: lane-full vregs
    emb_p = jnp.pad(emb_table, ((0, 0), (0, Dp - D)))
    trans_p = jnp.pad(all_trans_embs, ((0, 0), (0, Dp - D)))

    # Row gathers on device (only the gathered (B, Dp) slabs enter kernels).
    # TODO(synk): for production vocab sizes replace with a manual
    # double-buffered pltpu.make_async_copy gather driven by scalar-prefetched
    # row ids (table cannot live in VMEM).
    lhs_emb = jnp.take(emb_p, jnp.asarray(lhs_rows), axis=0)     # (B, Dp)
    rhs_emb = jnp.take(emb_p, jnp.asarray(rhs_rows), axis=0)     # (B, Dp)
    trans_g = jnp.take(trans_p, jnp.asarray(rel), axis=0)        # (B, Dp)

    # Positive scores: pad batch to a lane-aligned tile and present (Dp, Bp)
    # transposed slabs so the reduction output is lane-dense.
    Bp = _round_up(max(batch, LANE), LANE)
    pad_b = Bp - batch
    lhs_T = jnp.pad(lhs_emb, ((0, pad_b), (0, 0))).T             # (Dp, Bp)
    rhs_T = jnp.pad(rhs_emb, ((0, pad_b), (0, 0))).T
    trans_T = jnp.pad(trans_g, ((0, pad_b), (0, 0))).T
    scores = twhin_score(lhs_T, rhs_T, trans_T)[0, :batch]       # (B,)

    # In-batch negatives: sampling indices depend only on `rel` (host ints);
    # embedding values never leave the device; all relations x both
    # directions run in ONE batched pallas_call.
    # TODO(synk): torch.randperm replaced with a deterministic numpy
    # RandomState permutation (not bit-equivalent to torch's sampling stream).
    rng = np.random.RandomState(0)
    group_specs = []     # (a_src, a_rows, b_src, b_rows)
    rel_order = []       # (g_negs_lhs, g_negs_rhs, m, n) in relation order
    for relation in range(num_relations):
        rel_rows = np.nonzero(rel == relation)[0].astype(np.int32)
        rel_count = int(rel_rows.shape[0])
        if not rel_count:
            continue
        reps = math.ceil(float(in_batch_negatives) / rel_count)
        lhs_perm = np.tile(rng.permutation(rel_count), reps)[:in_batch_negatives]
        rhs_perm = np.tile(rng.permutation(rel_count), reps)[:in_batch_negatives]
        sampled_lhs_idx = rel_rows[lhs_perm]
        sampled_rhs_idx = rel_rows[rhs_perm]
        g_lhs = len(group_specs)        # negs_lhs = rhs_matrix @ sampled_lhs.T
        group_specs.append(("rhs", rel_rows, "lhs", sampled_lhs_idx))
        g_rhs = len(group_specs)        # negs_rhs = lhs_matrix @ sampled_rhs.T
        group_specs.append(("lhs", rel_rows, "rhs", sampled_rhs_idx))
        rel_order.append((g_lhs, g_rhs, rel_count, in_batch_negatives))

    negs = []
    if group_specs:
        src_dev = {"lhs": lhs_emb, "rhs": rhs_emb}
        M_pad = max(_round_up(max(len(s[1]) for s in group_specs), SUBLANE), SUBLANE)
        N_pad = _round_up(in_batch_negatives, LANE)   # lane-dense output columns
        a_stack, bt_stack = [], []
        for a_src, a_rows, b_src, b_rows in group_specs:
            a_idx = np.zeros((M_pad,), np.int32); a_idx[:len(a_rows)] = a_rows
            b_idx = np.zeros((N_pad,), np.int32); b_idx[:len(b_rows)] = b_rows
            a_stack.append(jnp.take(src_dev[a_src], jnp.asarray(a_idx), axis=0))
            bt_stack.append(jnp.take(src_dev[b_src], jnp.asarray(b_idx), axis=0).T)
        neg_out = neg_scores_batched(jnp.stack(a_stack), jnp.stack(bt_stack))
        for g_lhs, g_rhs, m, n in rel_order:
            negs.append(neg_out[g_lhs, :m, :n].reshape(-1))
            negs.append(neg_out[g_rhs, :m, :n].reshape(-1))

    out = jnp.concatenate([scores, *negs])
    jax.block_until_ready(out)

    # ----------------------- numpy reference check --------------------------
    emb_np = np.asarray(emb_table)
    trans_np = np.asarray(all_trans_embs)
    lhs_e = emb_np[lhs_rows]
    rhs_e = emb_np[rhs_rows]
    tr_e = trans_np[rel]
    ref = [np.sum(lhs_e * (rhs_e + tr_e), axis=-1)]
    src_np = {"lhs": lhs_e, "rhs": rhs_e}
    for g_lhs, g_rhs, m, n in rel_order:
        for g in (g_lhs, g_rhs):
            a_src, a_rows, b_src, b_rows = group_specs[g]
            ref.append((src_np[a_src][a_rows] @ src_np[b_src][b_rows].T).reshape(-1))
    ref = np.concatenate(ref)
    np.testing.assert_allclose(np.asarray(out), ref, rtol=2e-2, atol=2e-2)

    print("KERNEL_OK")
</pallas_src>

<mosaic_0001>
module attributes {stable_mosaic.version = 11 : i64} {
  func.func @_score_kernel(%arg0: i32, %arg1: memref<128x128xf32, #tpu.memory_space<vmem>>, %arg2: memref<128x128xf32, #tpu.memory_space<vmem>>, %arg3: memref<128x128xf32, #tpu.memory_space<vmem>>, %arg4: memref<1x128xf32, #tpu.memory_space<vmem>>) attributes {dimension_semantics = [#tpu.dimension_semantics<parallel>], iteration_bounds = array<i64: 1>, scalar_prefetch = 0 : i64, scratch_operands = 0 : i64, tpu.core_type = #tpu.core_type<tc>, window_params = [{transform_indices = @transform_0, window_bounds = array<i64: 128, 128>}, {transform_indices = @transform_1, window_bounds = array<i64: 128, 128>}, {transform_indices = @transform_2, window_bounds = array<i64: 128, 128>}, {transform_indices = @transform_3, window_bounds = array<i64: 1, 128>}]} {
    %c0 = arith.constant 0 : index
    %c0_0 = arith.constant 0 : index
    %0 = vector.load %arg1[%c0, %c0_0] : memref<128x128xf32, #tpu.memory_space<vmem>>, vector<128x128xf32>
    %c0_1 = arith.constant 0 : index
    %c0_2 = arith.constant 0 : index
    %1 = vector.load %arg2[%c0_1, %c0_2] : memref<128x128xf32, #tpu.memory_space<vmem>>, vector<128x128xf32>
    %c0_3 = arith.constant 0 : index
    %c0_4 = arith.constant 0 : index
    %2 = vector.load %arg3[%c0_3, %c0_4] : memref<128x128xf32, #tpu.memory_space<vmem>>, vector<128x128xf32>
    %3 = arith.addf %1, %2 : vector<128x128xf32>
    %4 = arith.mulf %0, %3 : vector<128x128xf32>
    %cst = arith.constant dense<0.000000e+00> : vector<128xf32>
    %5 = vector.multi_reduction <add>, %4, %cst [0] : vector<128x128xf32> to vector<128xf32>
    %6 = vector.shape_cast %5 : vector<128xf32> to vector<1x128xf32>
    %c0_5 = arith.constant 0 : index
    %c0_6 = arith.constant 0 : index
    %7 = vector.load %arg4[%c0_5, %c0_6] : memref<1x128xf32, #tpu.memory_space<vmem>>, vector<1x128xf32>
    tpu.vector_store %arg4[%c0_5, %c0_6], %6 {strides = array<i32>} : memref<1x128xf32, #tpu.memory_space<vmem>>, vector<1x128xf32>,
    return
  }
  func.func @transform_0(%arg0: i32) -> (i32, i32) {
    %c0_i32 = arith.constant 0 : i32
    %c0_i32_0 = arith.constant 0 : i32
    return %c0_i32, %arg0 : i32, i32
  }
  func.func @transform_1(%arg0: i32) -> (i32, i32) {
    %c0_i32 = arith.constant 0 : i32
    %c0_i32_0 = arith.constant 0 : i32
    return %c0_i32, %arg0 : i32, i32
  }
  func.func @transform_2(%arg0: i32) -> (i32, i32) {
    %c0_i32 = arith.constant 0 : i32
    %c0_i32_0 = arith.constant 0 : i32
    return %c0_i32, %arg0 : i32, i32
  }
  func.func @transform_3(%arg0: i32) -> (i32, i32) {
    %c0_i32 = arith.constant 0 : i32
    %c0_i32_0 = arith.constant 0 : i32
    return %c0_i32, %arg0 : i32, i32
  }
}

</mosaic_0001>

<bundles_post_ra>
// kernel: tpu_custom_call.1
= control target key start
LH: loop header
LB: loop body
LE: loop exit
PB: predicated region body
PF: predicated region fallthrough
CT: control target
= control target key end

     0   :  { %8 = vsyncpa [#allocation3], 0  ;;  %s364_s0 = inlined_call_operand.hbm [shape: f32[128,128], index: 0, kind: input, shape index: {}]   ;;  %s365_s1 = inlined_call_operand.hbm [shape: f32[128,128], index: 1, kind: input, shape index: {}]   ;;  %s366_s2 = inlined_call_operand.hbm [shape: f32[128,128], index: 2, kind: input, shape index: {}]   ;;  %s367_s3 = inlined_call_operand.hbm [shape: f32[1,128], index: 3, kind: output, shape index: {}]  }
   0x1   :  { %9 = vsyncpa [#allocation6], 0 }
   0x2   :  { %10 = vsyncpa [#allocation4], 0  ;;  %s274_s12 = smov [#allocation5]   ;;  %s275_s14 = smov [#allocation2]  }
   0x3   :  { %s28_s13 = sshll.u32 %s274_s12, 4  ;;  %s16_s15 = sshll.u32 %s275_s14, 4  ;;  %s29_s13 = int_to_ptr.vmem [resolvable:$true] %s28_s13  ;;  %s300_s15 = int_to_ptr.vmem [resolvable:$true] %s16_s15 }
   0x4   :  { %s180_s18 = scalar_lea.hbm %s365_s1, 2048 }
   0x5   :  { %p181_p0 = scmp.ne.s32.totalorder %s365_s1, %s180_s18  ;;  %p184_p1 = scmp.lt.u32.totalorder %s180_s18, %s365_s1 }
   0x7   :  { %p186_p2 = pnand %p184_p1, %p181_p0 }
   0x9   :  { %189 = shalt.err (!%p186_p2)
}
   0xa   :  { %s190_s23 = scalar_lea.vmem %s29_s13, 2048  ;;  %p195_p4 = scmp.lt.s32.totalorder %s29_s13, %s29_s13 }
   0xb   :  { %p191_p3 = scmp.ne.s32.totalorder %s29_s13, %s190_s23  ;;  %p196_p5 = scmp.lt.s32.totalorder %s190_s23, %s190_s23 }
   0xd   :  { %p197_p6 = por %p196_p5, %p195_p4 }
   0xf   :  { %p198_p7 = pnand %p197_p6, %p191_p3 }
  0x11   :  { %201 = shalt.err (!%p198_p7)
}
  0x12   :  { %s276_s24 = smov 128   ;;  %s277_s25 = smov 8  }
  0x13   :  { %34 = dma.hbm_to_vmem [thread:$0]  %s365_s1, 2048, %s29_s13, [#allocation6], %s276_s24, %s276_s24, %s277_s25  }
  0x14   :  { %s202_s30 = scalar_lea.hbm %s364_s0, 2048 }
  0x15   :  { %p203_p8 = scmp.ne.s32.totalorder %s364_s0, %s202_s30  ;;  %p206_p9 = scmp.lt.u32.totalorder %s202_s30, %s364_s0 }
  0x17   :  { %p208_p10 = pnand %p206_p9, %p203_p8 }
  0x19   :  { %211 = shalt.err (!%p208_p10)
}
  0x1a   :  { %s212_s8 = scalar_lea.vmem %s300_s15, 2048  ;;  %p217_p12 = scmp.lt.s32.totalorder %s300_s15, %s300_s15 }
  0x1b   :  { %p213_p11 = scmp.ne.s32.totalorder %s300_s15, %s212_s8  ;;  %p218_p13 = scmp.lt.s32.totalorder %s212_s8, %s212_s8 }
  0x1d   :  { %p219_p0 = por %p218_p13, %p217_p12 }
  0x1f   :  { %p220_p1 = pnand %p219_p0, %p213_p11 }
  0x21   :  { %223 = shalt.err (!%p220_p1)
}
  0x22   :  { %22 = dma.hbm_to_vmem [thread:$0]  %s364_s0, 2048, %s300_s15, [#allocation3], %s276_s24, %s276_s24, %s277_s25  }
  0x23   :  { %s278_s10 = smov [#allocation7]   ;;  %s224_s14 = scalar_lea.hbm %s366_s2, 2048 }
  0x24   :  { %s40_s11 = sshll.u32 %s278_s10, 4  ;;  %p225_p2 = scmp.ne.s32.totalorder %s366_s2, %s224_s14  ;;  %s41_s11 = int_to_ptr.vmem [resolvable:$true] %s40_s11 }
  0x25   :  { %p228_p3 = scmp.lt.u32.totalorder %s224_s14, %s366_s2 }
  0x27   :  { %p230_p4 = pnand %p228_p3, %p225_p2 }
  0x29   :  { %233 = shalt.err (!%p230_p4)
}
  0x2a   :  { %s234_s20 = scalar_lea.vmem %s41_s11, 2048  ;;  %p239_p6 = scmp.lt.s32.totalorder %s41_s11, %s41_s11 }
  0x2b   :  { %p235_p5 = scmp.ne.s32.totalorder %s41_s11, %s234_s20  ;;  %p240_p7 = scmp.lt.s32.totalorder %s234_s20, %s234_s20 }
  0x2d   :  { %p241_p8 = por %p240_p7, %p239_p6 }
  0x2f   :  { %p242_p9 = pnand %p241_p8, %p235_p5 }
  0x31   :  { %245 = shalt.err (!%p242_p9)
}
  0x32   :  { %46 = dma.hbm_to_vmem [thread:$0]  %s366_s2, 2048, %s41_s11, [#allocation6], %s276_s24, %s276_s24, %s277_s25  }
  0x33   :  { %268 = dma.done.wait [#allocation3], 2048  }
  0x34   :  { %269 = vsyncadd [#allocation3], 4294965248 }
  0x35   :  { %270 = dma.done.wait [#allocation6], 4096  }
  0x36   :  { %271 = vsyncadd [#allocation6], 4294963200  ;;  %v72_v0 = vld [vmem:[#allocation5] sm:$0xff]  ;;  %v73_v1 = vld [vmem:[#allocation5 + $0x8] sm:$0xff]  ;;  %s279_s2 = smov [#allocation8]  }
  0x37   :  { %v88_v2 = vld [vmem:[#allocation7] sm:$0xff]  ;;  %v74_v3 = vld [vmem:[#allocation5 + $0x10] sm:$0xff]  ;;  %v89_v4 = vld [vmem:[#allocation7 + $0x8] sm:$0xff]  ;;  %s164_s21 = sshll.u32 %s279_s2, 4  ;;  %s165_s21 = int_to_ptr.vmem [resolvable:$true] %s164_s21 }
  0x38   :  { %v90_v5 = vld [vmem:[#allocation7 + $0x10] sm:$0xff]  ;;  %v56_v6 = vld [vmem:[#allocation2] sm:$0xff]  ;;  %v104_v7 = vadd.f32 %v88_v2, %v72_v0  ;;  %v105_v8 = vadd.f32 %v89_v4, %v73_v1  ;;  %v57_v9 = vld [vmem:[#allocation2 + $0x8] sm:$0xff]  ;;  %s246_s22 = scalar_lea.vmem %s165_s21, 16  ;;  %s250_s23 = scalar_lea.vmem %s165_s21, 32 }
  0x39   :  { %v75_v10 = vld [vmem:[#allocation5 + $0x18] sm:$0xff]  ;;  %v106_v12 = vadd.f32 %v90_v5, %v74_v3  ;;  %v58_v13 = vld [vmem:[#allocation2 + $0x10] sm:$0xff]  ;;  %v76_v14 = vld [vmem:[#allocation5 + $0x20] sm:$0xff]  ;;  %p247_p10 = scmp.ne.s32.totalorder %s165_s21, %s246_s22  ;;  %p251_p11 = scmp.lt.s32.totalorder %s165_s21, %s165_s21 }
  0x3a   :  { %v91_v11 = vld [vmem:[#allocation7 + $0x18] sm:$0xff]  ;;  %v92_v15 = vld [vmem:[#allocation7 + $0x20] sm:$0xff]  ;;  %v120_v17 = vmul.f32 %v104_v7, %v56_v6  ;;  %v121_v18 = vmul.f32 %v105_v8, %v57_v9  ;;  %v77_v20 = vld [vmem:[#allocation5 + $0x28] sm:$0xff]  ;;  %p252_p12 = scmp.lt.s32.totalorder %s250_s23, %s246_s22 }
  0x3b   :  { %v107_v16 = vadd.f32 %v91_v11, %v75_v10  ;;  %v59_v19 = vld [vmem:[#allocation2 + $0x18] sm:$0xff]  ;;  %v93_v21 = vld [vmem:[#allocation7 + $0x28] sm:$0xff]  ;;  %v108_v22 = vadd.f32 %v92_v15, %v76_v14  ;;  %v122_v23 = vmul.f32 %v106_v12, %v58_v13  ;;  %v60_v24 = vld [vmem:[#allocation2 + $0x20] sm:$0xff] }
  0x3c   :  { %v78_v25 = vld [vmem:[#allocation5 + $0x30] sm:$0xff]  ;;  %v109_v27 = vadd.f32 %v93_v21, %v77_v20  ;;  %v136_v29 = vadd.f32 %v121_v18, %v120_v17  ;;  %v61_v30 = vld [vmem:[#allocation2 + $0x28] sm:$0xff]  ;;  %v79_v31 = vld [vmem:[#allocation5 + $0x38] sm:$0xff]  ;;  %p253_p13 = por %p252_p12, %p251_p11 }
  0x3d   :  { %v94_v26 = vld [vmem:[#allocation7 + $0x30] sm:$0xff]  ;;  %v123_v28 = vmul.f32 %v107_v16, %v59_v19  ;;  %v95_v32 = vld [vmem:[#allocation7 + $0x38] sm:$0xff]  ;;  %v124_v34 = vmul.f32 %v108_v22, %v60_v24  ;;  %v80_v37 = vld [vmem:[#allocation5 + $0x40] sm:$0xff] }
  0x3e   :  { %v110_v33 = vadd.f32 %v94_v26, %v78_v25  ;;  %v137_v35 = vadd.f32 %v136_v29, %v122_v23  ;;  %v62_v36 = vld [vmem:[#allocation2 + $0x30] sm:$0xff]  ;;  %v96_v38 = vld [vmem:[#allocation7 + $0x40] sm:$0xff]  ;;  %v111_v39 = vadd.f32 %v95_v32, %v79_v31  ;;  %v125_v40 = vmul.f32 %v109_v27, %v61_v30  ;;  %v63_v42 = vld [vmem:[#allocation2 + $0x38] sm:$0xff]  ;;  %p254_p0 = pnand %p253_p13, %p247_p10 }
  0x3f   :  { %v81_v43 = vld [vmem:[#allocation5 + $0x48] sm:$0xff]  ;;  %v112_v45 = vadd.f32 %v96_v38, %v80_v37  ;;  %v64_v48 = vld [vmem:[#allocation2 + $0x40] sm:$0xff]  ;;  %v82_v49 = vld [vmem:[#allocation5 + $0x50] sm:$0xff] }
  0x40   :  { %v138_v41 = vadd.f32 %v137_v35, %v123_v28  ;;  %v97_v44 = vld [vmem:[#allocation7 + $0x48] sm:$0xff]  ;;  %v126_v46 = vmul.f32 %v110_v33, %v62_v36  ;;  %v98_v50 = vld [vmem:[#allocation7 + $0x50] sm:$0xff]  ;;  %v127_v52 = vmul.f32 %v111_v39, %v63_v42  ;;  %v83_v55 = vld [vmem:[#allocation5 + $0x58] sm:$0xff] }
  0x41   :  { %v113_v51 = vadd.f32 %v97_v44, %v81_v43  ;;  %v65_v54 = vld [vmem:[#allocation2 + $0x48] sm:$0xff]  ;;  %v99_v56 = vld [vmem:[#allocation7 + $0x58] sm:$0xff]  ;;  %v114_v57 = vadd.f32 %v98_v50, %v82_v49  ;;  %v128_v58 = vmul.f32 %v112_v45, %v64_v48  ;;  %v66_v60 = vld [vmem:[#allocation2 + $0x50] sm:$0xff] }
  0x42   :  { %v139_v47 = vadd.f32 %v138_v41, %v124_v34  ;;  %v84_v61 = vld [vmem:[#allocation5 + $0x60] sm:$0xff]  ;;  %v115_v63 = vadd.f32 %v99_v56, %v83_v55  ;;  %v67_v2 = vld [vmem:[#allocation2 + $0x58] sm:$0xff]  ;;  %v85_v3 = vld [vmem:[#allocation5 + $0x68] sm:$0xff] }
  0x43   :  { %v100_v62 = vld [vmem:[#allocation7 + $0x60] sm:$0xff]  ;;  %v129_v0 = vmul.f32 %v113_v51, %v65_v54  ;;  %v101_v4 = vld [vmem:[#allocation7 + $0x68] sm:$0xff]  ;;  %v130_v6 = vmul.f32 %v114_v57, %v66_v60  ;;  %v86_v9 = vld [vmem:[#allocation5 + $0x70] sm:$0xff] }
  0x44   :  { %v140_v53 = vadd.f32 %v139_v47, %v125_v40  ;;  %v116_v5 = vadd.f32 %v100_v62, %v84_v61  ;;  %v68_v8 = vld [vmem:[#allocation2 + $0x60] sm:$0xff]  ;;  %v102_v10 = vld [vmem:[#allocation7 + $0x70] sm:$0xff]  ;;  %v117_v11 = vadd.f32 %v101_v4, %v85_v3  ;;  %v131_v12 = vmul.f32 %v115_v63, %v67_v2  ;;  %v69_v14 = vld [vmem:[#allocation2 + $0x68] sm:$0xff] }
  0x45   :  { %v87_v15 = vld [vmem:[#allocation5 + $0x78] sm:$0xff]  ;;  %v118_v17 = vadd.f32 %v102_v10, %v86_v9  ;;  %v70_v20 = vld [vmem:[#allocation2 + $0x70] sm:$0xff] }
  0x46   :  { %v141_v59 = vadd.f32 %v140_v53, %v126_v46  ;;  %v103_v16 = vld [vmem:[#allocation7 + $0x78] sm:$0xff]  ;;  %v132_v18 = vmul.f32 %v116_v5, %v68_v8  ;;  %v133_v22 = vmul.f32 %v117_v11, %v69_v14 }
  0x47   :  { %v119_v21 = vadd.f32 %v103_v16, %v87_v15  ;;  %v71_v24 = vld [vmem:[#allocation2 + $0x78] sm:$0xff]  ;;  %v134_v25 = vmul.f32 %v118_v17, %v70_v20 }
  0x48   :  { %v142_v1 = vadd.f32 %v141_v59, %v127_v52 }
  0x49   :  { %v135_v27 = vmul.f32 %v119_v21, %v71_v24 }
  0x4a   :  { %v143_v7 = vadd.f32 %v142_v1, %v128_v58 }
  0x4c   :  { %v144_v13 = vadd.f32 %v143_v7, %v129_v0 }
  0x4e   :  { %v145_v19 = vadd.f32 %v144_v13, %v130_v6 }
  0x50   :  { %v146_v23 = vadd.f32 %v145_v19, %v131_v12 }
  0x52   :  { %v147_v26 = vadd.f32 %v146_v23, %v132_v18 }
  0x54   :  { %v148_v28 = vadd.f32 %v147_v26, %v133_v22 }
  0x56   :  { %v149_v29 = vadd.f32 %v148_v28, %v134_v25 }
  0x58   :  { %v150_v30 = vadd.f32 %v149_v29, %v135_v27 }
  0x5a   :  { %v151_v31 = vrot.slane %v150_v30, 4 }
  0x5c   :  { %v152_v32 = vadd.f32 %v151_v31, %v150_v30 }
  0x5e   :  { %v153_v33 = vrot.slane %v152_v32, 2 }
  0x60   :  { %v154_v34 = vadd.f32 %v153_v33, %v152_v32 }
  0x62   :  { %v155_v35 = vrot.slane %v154_v34, 1 }
  0x64   :  { %v156_v36 = vadd.f32 %v155_v35, %v154_v34 }
  0x66   :  { %157 = vst [vmem:[#allocation8] sm:$0x1] %v156_v36 }
  0x67   :  { %257 = shalt.err (!%p254_p0)
}
  0x68   :  { %s258_s26 = scalar_lea.hbm %s367_s3, 16 }
  0x69   :  { %p259_p1 = scmp.ne.s32.totalorder %s367_s3, %s258_s26  ;;  %p262_p2 = scmp.lt.u32.totalorder %s258_s26, %s367_s3 }
  0x6b   :  { %p264_p3 = pnand %p262_p2, %p259_p1 }
  0x6d   :  { %267 = shalt.err (!%p264_p3)
}
  0x6e   :  { %167 = dma.vmem_to_hbm [thread:$0]  %s165_s21, 16, %s367_s3, [#allocation4]  }
  0x6f   :  { %272 = dma.done.wait [#allocation4], 16  }
  0x70   :  { %273 = vsyncadd [#allocation4], 4294967280 }
  0x71   :  { %171 = vsyncpa [#allocation3], 1 }
  0x72   :  { %172 = vsyncpa [#allocation6], 1 }
  0x73   :  { %173 = vsyncpa [#allocation4], 1 }

</bundles_post_ra>
